<compile_context>
chip_gen: v5e
topology: v5e:2x2
jax: 0.10.0
libtpu: 0.0.40
codegen_flags: <defaults>
</compile_context>

<pallas_src>
import jax
import jax.numpy as jnp
from jax.experimental import pallas as pl
from jax.experimental.pallas import tpu as pltpu


_BLOCK_BUDGET_BYTES = 12 << 20   # per output block; pipeline double-buffers -> ~24 MiB
_VMEM_LIMIT_BYTES = 32 << 20     # explicit scoped-VMEM limit (safe on v5e/v6e/v7x)
_MIN_GRID_STEPS = 4              # keep both v7x TensorCores + the pipeline busy


def _make_permute_kernel(use_channel_dma):
    """Build the (B,C,S,D)->(B,S,C,D) pure-DMA copy kernel.

    use_channel_dma=True : one DMA per channel c
        src  x[b, c, s0:s0+s_blk, :]   (contiguous in HBM)
        dst  o_blk[0, :, c, :]         (sublane-strided in VMEM, 32-bit dtypes)
    use_channel_dma=False: one DMA per output row j
        src  x[b, :, s0+j, :]          (D-length runs, strided in HBM)
        dst  o_blk[0, j, :, :]         (contiguous in VMEM)

    Either way, the output HBM writeback is the pipeline's single fully
    contiguous, lane-dense (s_blk, C, D) slab DMA per grid step.
    """

    def kernel(x_hbm, o_ref, copy_sems):
        b = pl.program_id(0)
        si = pl.program_id(1)
        _, s_blk, num_ch, _ = o_ref.shape
        s0 = pl.multiple_of(si * s_blk, s_blk)

        if use_channel_dma:
            copies = [
                pltpu.make_async_copy(
                    x_hbm.at[b, c, pl.ds(s0, s_blk), :],
                    o_ref.at[0, :, c, :],
                    copy_sems.at[c],
                )
                for c in range(num_ch)
            ]
        else:
            copies = [
                pltpu.make_async_copy(
                    x_hbm.at[b, :, s0 + j, :],
                    o_ref.at[0, j, :, :],
                    copy_sems.at[j],
                )
                for j in range(s_blk)
            ]

        # Issue everything first, then wait: all copies are in flight together
        # so the DMA engine streams the whole block back-to-back.
        for cp in copies:
            cp.start()
        for cp in copies:
            cp.wait()

    return kernel


def _pick_s_block(B, C, S, D, itemsize):
    """Largest S-chunk dividing S whose output block fits the VMEM budget,
    preferring chunks that leave >= _MIN_GRID_STEPS grid steps (v7x megacore /
    pipeline overlap).  The block's minor dims are always the full (C, D), so
    any s_blk is layout-legal."""
    row_bytes = C * D * itemsize
    max_rows = max(1, _BLOCK_BUDGET_BYTES // row_bytes)
    divisors = [d for d in range(1, S + 1) if S % d == 0]
    fitting = [d for d in divisors if d <= max_rows]
    preferred = [d for d in fitting if B * (S // d) >= _MIN_GRID_STEPS]
    return max(preferred if preferred else fitting)


def seq_layer_norm_view_forward(x):
    """x: (B, C, S, D) -> (B, S, C, D)   (== torch permute(0, 2, 1, 3)).

    NOTE: the cheapest permute is the one you never materialize -- if possible,
    fuse it into the consumer by indexing (b, c, s, d) straight out of the
    original layout in that kernel's BlockSpec index_map.  This kernel is for
    when the permuted tensor must actually exist in HBM.
    """
    B, C, S, D = x.shape
    itemsize = x.dtype.itemsize
    s_blk = _pick_s_block(B, C, S, D, itemsize)
    grid = (B, S // s_blk)

    # 32-bit (and wider) dtypes tolerate a sublane-strided VMEM destination, so
    # prefer per-channel copies (fewer DMAs, fully contiguous HBM reads).
    # Packed dtypes and the C > s_blk regime use per-row copies instead.
    use_channel_dma = (itemsize >= 4) and (C <= s_blk)
    n_copies = C if use_channel_dma else s_blk
    # TODO(synk): if a single (1, C, D) row ever exceeds the VMEM limit, also
    # chunk the C axis (needs C % 8 == 0 blocks); not required for sane shapes.

    return pl.pallas_call(
        _make_permute_kernel(use_channel_dma),
        out_shape=jax.ShapeDtypeStruct((B, S, C, D), x.dtype),
        grid_spec=pltpu.PrefetchScalarGridSpec(
            num_scalar_prefetch=0,
            grid=grid,
            in_specs=[
                # Raw HBM ref: no input VMEM staging; the manual DMAs read it
                # directly into the output block, already permuted.
                pl.BlockSpec(memory_space=pl.ANY),
            ],
            # Lane-dense, full-(C, D) output block -> the writeback is one
            # contiguous unmasked DMA per grid step, double-buffered by Pallas.
            out_specs=pl.BlockSpec((1, s_blk, C, D), lambda b, si: (b, si, 0, 0)),
            scratch_shapes=[pltpu.SemaphoreType.DMA((n_copies,))],
        ),
        compiler_params=pltpu.CompilerParams(
            dimension_semantics=("parallel", "parallel"),
            vmem_limit_bytes=_VMEM_LIMIT_BYTES,
        ),
    )(x)


if __name__ == "__main__":
    # Small 4-D shape consistent with the module's forward: (B, C, S, D).
    # D = 128 keeps the lane axis a full vreg width even at tiny sizes.
    B, C, S, D = 2, 4, 16, 128

    key = jax.random.PRNGKey(0)
    x = jax.random.normal(key, (B, C, S, D), dtype=jnp.float32)

    out = seq_layer_norm_view_forward(x)
    jax.block_until_ready(out)

    ref = jnp.transpose(x, (0, 2, 1, 3))
    assert out.shape == (B, S, C, D)
    assert bool(jnp.array_equal(out, ref)), "permute mismatch"

    print("KERNEL_OK")
</pallas_src>

<mosaic_0001>
module attributes {stable_mosaic.version = 11 : i64} {
  func.func @kernel(%arg0: i32, %arg1: i32, %arg2: memref<2x4x16x128xf32, #tpu.memory_space<any>>, %arg3: memref<1x8x4x128xf32, #tpu.memory_space<vmem>>, %arg4: memref<4x!tpu.dma_semaphore, #tpu.memory_space<semaphore_mem>>) attributes {dimension_semantics = [#tpu.dimension_semantics<parallel>, #tpu.dimension_semantics<parallel>], iteration_bounds = array<i64: 2, 2>, scalar_prefetch = 0 : i64, scratch_operands = 1 : i64, tpu.core_type = #tpu.core_type<tc>, window_params = [{}, {transform_indices = @transform_1, window_bounds = array<i64: 1, 8, 4, 128>}]} {
    %c8_i32 = arith.constant 8 : i32
    %0 = arith.muli %arg1, %c8_i32 : i32
    %1 = tpu.assume_multiple %0, 8 : i32
    %c0_i32 = arith.constant 0 : i32
    %c0_i32_0 = arith.constant 0 : i32
    %c0_i32_1 = arith.constant 0 : i32
    %c0_i32_2 = arith.constant 0 : i32
    %c0_i32_3 = arith.constant 0 : i32
    %2 = tpu.memref_slice %arg2[%arg0, %c0_i32, %1, %c0_i32_3] : memref<2x4x16x128xf32, #tpu.memory_space<any>> -> memref<1x1x8x128xf32, #tpu.memory_space<any>>
    %3 = tpu.memref_squeeze %2 : memref<1x1x8x128xf32, #tpu.memory_space<any>> -> memref<8x128xf32, #tpu.memory_space<any>>
    %c0_i32_4 = arith.constant 0 : i32
    %c0_i32_5 = arith.constant 0 : i32
    %4 = tpu.memref_slice %arg3[%c0_i32_0, %c0_i32_4, %c0_i32_1, %c0_i32_5] : memref<1x8x4x128xf32, #tpu.memory_space<vmem>> -> memref<1x8x1x128xf32, #tpu.memory_space<vmem>>
    %5 = tpu.memref_squeeze %4 : memref<1x8x1x128xf32, #tpu.memory_space<vmem>> -> memref<8x128xf32, #tpu.memory_space<vmem>>
    %6 = tpu.memref_slice %arg4[%c0_i32_2] : memref<4x!tpu.dma_semaphore, #tpu.memory_space<semaphore_mem>> -> memref<1x!tpu.dma_semaphore, #tpu.memory_space<semaphore_mem>>
    %7 = tpu.memref_squeeze %6 : memref<1x!tpu.dma_semaphore, #tpu.memory_space<semaphore_mem>> -> memref<!tpu.dma_semaphore, #tpu.memory_space<semaphore_mem>>
    tpu.enqueue_dma source(%3 : memref<8x128xf32, #tpu.memory_space<any>>) target(%5 : memref<8x128xf32, #tpu.memory_space<vmem>>) target_semaphore(%7 : memref<!tpu.dma_semaphore, #tpu.memory_space<semaphore_mem>>)
    %c1_i32 = arith.constant 1 : i32
    %c0_i32_6 = arith.constant 0 : i32
    %c1_i32_7 = arith.constant 1 : i32
    %c1_i32_8 = arith.constant 1 : i32
    %c0_i32_9 = arith.constant 0 : i32
    %8 = tpu.memref_slice %arg2[%arg0, %c1_i32, %1, %c0_i32_9] : memref<2x4x16x128xf32, #tpu.memory_space<any>> -> memref<1x1x8x128xf32, #tpu.memory_space<any>>
    %9 = tpu.memref_squeeze %8 : memref<1x1x8x128xf32, #tpu.memory_space<any>> -> memref<8x128xf32, #tpu.memory_space<any>>
    %c0_i32_10 = arith.constant 0 : i32
    %c0_i32_11 = arith.constant 0 : i32
    %10 = tpu.memref_slice %arg3[%c0_i32_6, %c0_i32_10, %c1_i32_7, %c0_i32_11] : memref<1x8x4x128xf32, #tpu.memory_space<vmem>> -> memref<1x8x1x128xf32, #tpu.memory_space<vmem>>
    %11 = tpu.memref_squeeze %10 : memref<1x8x1x128xf32, #tpu.memory_space<vmem>> -> memref<8x128xf32, #tpu.memory_space<vmem>>
    %12 = tpu.memref_slice %arg4[%c1_i32_8] : memref<4x!tpu.dma_semaphore, #tpu.memory_space<semaphore_mem>> -> memref<1x!tpu.dma_semaphore, #tpu.memory_space<semaphore_mem>>
    %13 = tpu.memref_squeeze %12 : memref<1x!tpu.dma_semaphore, #tpu.memory_space<semaphore_mem>> -> memref<!tpu.dma_semaphore, #tpu.memory_space<semaphore_mem>>
    tpu.enqueue_dma source(%9 : memref<8x128xf32, #tpu.memory_space<any>>) target(%11 : memref<8x128xf32, #tpu.memory_space<vmem>>) target_semaphore(%13 : memref<!tpu.dma_semaphore, #tpu.memory_space<semaphore_mem>>)
    %c2_i32 = arith.constant 2 : i32
    %c0_i32_12 = arith.constant 0 : i32
    %c2_i32_13 = arith.constant 2 : i32
    %c2_i32_14 = arith.constant 2 : i32
    %c0_i32_15 = arith.constant 0 : i32
    %14 = tpu.memref_slice %arg2[%arg0, %c2_i32, %1, %c0_i32_15] : memref<2x4x16x128xf32, #tpu.memory_space<any>> -> memref<1x1x8x128xf32, #tpu.memory_space<any>>
    %15 = tpu.memref_squeeze %14 : memref<1x1x8x128xf32, #tpu.memory_space<any>> -> memref<8x128xf32, #tpu.memory_space<any>>
    %c0_i32_16 = arith.constant 0 : i32
    %c0_i32_17 = arith.constant 0 : i32
    %16 = tpu.memref_slice %arg3[%c0_i32_12, %c0_i32_16, %c2_i32_13, %c0_i32_17] : memref<1x8x4x128xf32, #tpu.memory_space<vmem>> -> memref<1x8x1x128xf32, #tpu.memory_space<vmem>>
    %17 = tpu.memref_squeeze %16 : memref<1x8x1x128xf32, #tpu.memory_space<vmem>> -> memref<8x128xf32, #tpu.memory_space<vmem>>
    %18 = tpu.memref_slice %arg4[%c2_i32_14] : memref<4x!tpu.dma_semaphore, #tpu.memory_space<semaphore_mem>> -> memref<1x!tpu.dma_semaphore, #tpu.memory_space<semaphore_mem>>
    %19 = tpu.memref_squeeze %18 : memref<1x!tpu.dma_semaphore, #tpu.memory_space<semaphore_mem>> -> memref<!tpu.dma_semaphore, #tpu.memory_space<semaphore_mem>>
    tpu.enqueue_dma source(%15 : memref<8x128xf32, #tpu.memory_space<any>>) target(%17 : memref<8x128xf32, #tpu.memory_space<vmem>>) target_semaphore(%19 : memref<!tpu.dma_semaphore, #tpu.memory_space<semaphore_mem>>)
    %c3_i32 = arith.constant 3 : i32
    %c0_i32_18 = arith.constant 0 : i32
    %c3_i32_19 = arith.constant 3 : i32
    %c3_i32_20 = arith.constant 3 : i32
    %c0_i32_21 = arith.constant 0 : i32
    %20 = tpu.memref_slice %arg2[%arg0, %c3_i32, %1, %c0_i32_21] : memref<2x4x16x128xf32, #tpu.memory_space<any>> -> memref<1x1x8x128xf32, #tpu.memory_space<any>>
    %21 = tpu.memref_squeeze %20 : memref<1x1x8x128xf32, #tpu.memory_space<any>> -> memref<8x128xf32, #tpu.memory_space<any>>
    %c0_i32_22 = arith.constant 0 : i32
    %c0_i32_23 = arith.constant 0 : i32
    %22 = tpu.memref_slice %arg3[%c0_i32_18, %c0_i32_22, %c3_i32_19, %c0_i32_23] : memref<1x8x4x128xf32, #tpu.memory_space<vmem>> -> memref<1x8x1x128xf32, #tpu.memory_space<vmem>>
    %23 = tpu.memref_squeeze %22 : memref<1x8x1x128xf32, #tpu.memory_space<vmem>> -> memref<8x128xf32, #tpu.memory_space<vmem>>
    %24 = tpu.memref_slice %arg4[%c3_i32_20] : memref<4x!tpu.dma_semaphore, #tpu.memory_space<semaphore_mem>> -> memref<1x!tpu.dma_semaphore, #tpu.memory_space<semaphore_mem>>
    %25 = tpu.memref_squeeze %24 : memref<1x!tpu.dma_semaphore, #tpu.memory_space<semaphore_mem>> -> memref<!tpu.dma_semaphore, #tpu.memory_space<semaphore_mem>>
    tpu.enqueue_dma source(%21 : memref<8x128xf32, #tpu.memory_space<any>>) target(%23 : memref<8x128xf32, #tpu.memory_space<vmem>>) target_semaphore(%25 : memref<!tpu.dma_semaphore, #tpu.memory_space<semaphore_mem>>)
    %c0_i32_24 = arith.constant 0 : i32
    %c0_i32_25 = arith.constant 0 : i32
    %c0_i32_26 = arith.constant 0 : i32
    %c0_i32_27 = arith.constant 0 : i32
    %c0_i32_28 = arith.constant 0 : i32
    %26 = tpu.memref_slice %arg2[%arg0, %c0_i32_24, %1, %c0_i32_28] : memref<2x4x16x128xf32, #tpu.memory_space<any>> -> memref<1x1x8x128xf32, #tpu.memory_space<any>>
    %27 = tpu.memref_squeeze %26 : memref<1x1x8x128xf32, #tpu.memory_space<any>> -> memref<8x128xf32, #tpu.memory_space<any>>
    %c0_i32_29 = arith.constant 0 : i32
    %c0_i32_30 = arith.constant 0 : i32
    %28 = tpu.memref_slice %arg3[%c0_i32_25, %c0_i32_29, %c0_i32_26, %c0_i32_30] : memref<1x8x4x128xf32, #tpu.memory_space<vmem>> -> memref<1x8x1x128xf32, #tpu.memory_space<vmem>>
    %29 = tpu.memref_squeeze %28 : memref<1x8x1x128xf32, #tpu.memory_space<vmem>> -> memref<8x128xf32, #tpu.memory_space<vmem>>
    %30 = tpu.memref_slice %arg4[%c0_i32_27] : memref<4x!tpu.dma_semaphore, #tpu.memory_space<semaphore_mem>> -> memref<1x!tpu.dma_semaphore, #tpu.memory_space<semaphore_mem>>
    %31 = tpu.memref_squeeze %30 : memref<1x!tpu.dma_semaphore, #tpu.memory_space<semaphore_mem>> -> memref<!tpu.dma_semaphore, #tpu.memory_space<semaphore_mem>>
    tpu.wait_dma2 semaphore(%31 : memref<!tpu.dma_semaphore, #tpu.memory_space<semaphore_mem>>) src(%27 : memref<8x128xf32, #tpu.memory_space<any>>) dst(%29 : memref<8x128xf32, #tpu.memory_space<vmem>>)
    %c1_i32_31 = arith.constant 1 : i32
    %c0_i32_32 = arith.constant 0 : i32
    %c1_i32_33 = arith.constant 1 : i32
    %c1_i32_34 = arith.constant 1 : i32
    %c0_i32_35 = arith.constant 0 : i32
    %32 = tpu.memref_slice %arg2[%arg0, %c1_i32_31, %1, %c0_i32_35] : memref<2x4x16x128xf32, #tpu.memory_space<any>> -> memref<1x1x8x128xf32, #tpu.memory_space<any>>
    %33 = tpu.memref_squeeze %32 : memref<1x1x8x128xf32, #tpu.memory_space<any>> -> memref<8x128xf32, #tpu.memory_space<any>>
    %c0_i32_36 = arith.constant 0 : i32
    %c0_i32_37 = arith.constant 0 : i32
    %34 = tpu.memref_slice %arg3[%c0_i32_32, %c0_i32_36, %c1_i32_33, %c0_i32_37] : memref<1x8x4x128xf32, #tpu.memory_space<vmem>> -> memref<1x8x1x128xf32, #tpu.memory_space<vmem>>
    %35 = tpu.memref_squeeze %34 : memref<1x8x1x128xf32, #tpu.memory_space<vmem>> -> memref<8x128xf32, #tpu.memory_space<vmem>>
    %36 = tpu.memref_slice %arg4[%c1_i32_34] : memref<4x!tpu.dma_semaphore, #tpu.memory_space<semaphore_mem>> -> memref<1x!tpu.dma_semaphore, #tpu.memory_space<semaphore_mem>>
    %37 = tpu.memref_squeeze %36 : memref<1x!tpu.dma_semaphore, #tpu.memory_space<semaphore_mem>> -> memref<!tpu.dma_semaphore, #tpu.memory_space<semaphore_mem>>
    tpu.wait_dma2 semaphore(%37 : memref<!tpu.dma_semaphore, #tpu.memory_space<semaphore_mem>>) src(%33 : memref<8x128xf32, #tpu.memory_space<any>>) dst(%35 : memref<8x128xf32, #tpu.memory_space<vmem>>)
    %c2_i32_38 = arith.constant 2 : i32
    %c0_i32_39 = arith.constant 0 : i32
    %c2_i32_40 = arith.constant 2 : i32
    %c2_i32_41 = arith.constant 2 : i32
    %c0_i32_42 = arith.constant 0 : i32
    %38 = tpu.memref_slice %arg2[%arg0, %c2_i32_38, %1, %c0_i32_42] : memref<2x4x16x128xf32, #tpu.memory_space<any>> -> memref<1x1x8x128xf32, #tpu.memory_space<any>>
    %39 = tpu.memref_squeeze %38 : memref<1x1x8x128xf32, #tpu.memory_space<any>> -> memref<8x128xf32, #tpu.memory_space<any>>
    %c0_i32_43 = arith.constant 0 : i32
    %c0_i32_44 = arith.constant 0 : i32
    %40 = tpu.memref_slice %arg3[%c0_i32_39, %c0_i32_43, %c2_i32_40, %c0_i32_44] : memref<1x8x4x128xf32, #tpu.memory_space<vmem>> -> memref<1x8x1x128xf32, #tpu.memory_space<vmem>>
    %41 = tpu.memref_squeeze %40 : memref<1x8x1x128xf32, #tpu.memory_space<vmem>> -> memref<8x128xf32, #tpu.memory_space<vmem>>
    %42 = tpu.memref_slice %arg4[%c2_i32_41] : memref<4x!tpu.dma_semaphore, #tpu.memory_space<semaphore_mem>> -> memref<1x!tpu.dma_semaphore, #tpu.memory_space<semaphore_mem>>
    %43 = tpu.memref_squeeze %42 : memref<1x!tpu.dma_semaphore, #tpu.memory_space<semaphore_mem>> -> memref<!tpu.dma_semaphore, #tpu.memory_space<semaphore_mem>>
    tpu.wait_dma2 semaphore(%43 : memref<!tpu.dma_semaphore, #tpu.memory_space<semaphore_mem>>) src(%39 : memref<8x128xf32, #tpu.memory_space<any>>) dst(%41 : memref<8x128xf32, #tpu.memory_space<vmem>>)
    %c3_i32_45 = arith.constant 3 : i32
    %c0_i32_46 = arith.constant 0 : i32
    %c3_i32_47 = arith.constant 3 : i32
    %c3_i32_48 = arith.constant 3 : i32
    %c0_i32_49 = arith.constant 0 : i32
    %44 = tpu.memref_slice %arg2[%arg0, %c3_i32_45, %1, %c0_i32_49] : memref<2x4x16x128xf32, #tpu.memory_space<any>> -> memref<1x1x8x128xf32, #tpu.memory_space<any>>
    %45 = tpu.memref_squeeze %44 : memref<1x1x8x128xf32, #tpu.memory_space<any>> -> memref<8x128xf32, #tpu.memory_space<any>>
    %c0_i32_50 = arith.constant 0 : i32
    %c0_i32_51 = arith.constant 0 : i32
    %46 = tpu.memref_slice %arg3[%c0_i32_46, %c0_i32_50, %c3_i32_47, %c0_i32_51] : memref<1x8x4x128xf32, #tpu.memory_space<vmem>> -> memref<1x8x1x128xf32, #tpu.memory_space<vmem>>
    %47 = tpu.memref_squeeze %46 : memref<1x8x1x128xf32, #tpu.memory_space<vmem>> -> memref<8x128xf32, #tpu.memory_space<vmem>>
    %48 = tpu.memref_slice %arg4[%c3_i32_48] : memref<4x!tpu.dma_semaphore, #tpu.memory_space<semaphore_mem>> -> memref<1x!tpu.dma_semaphore, #tpu.memory_space<semaphore_mem>>
    %49 = tpu.memref_squeeze %48 : memref<1x!tpu.dma_semaphore, #tpu.memory_space<semaphore_mem>> -> memref<!tpu.dma_semaphore, #tpu.memory_space<semaphore_mem>>
    tpu.wait_dma2 semaphore(%49 : memref<!tpu.dma_semaphore, #tpu.memory_space<semaphore_mem>>) src(%45 : memref<8x128xf32, #tpu.memory_space<any>>) dst(%47 : memref<8x128xf32, #tpu.memory_space<vmem>>)
    return
  }
  func.func @transform_1(%arg0: i32, %arg1: i32) -> (i32, i32, i32, i32) {
    %c0_i32 = arith.constant 0 : i32
    %c0_i32_0 = arith.constant 0 : i32
    %c0_i32_1 = arith.constant 0 : i32
    return %arg0, %arg1, %c0_i32, %c0_i32_0 : i32, i32, i32, i32
  }
}

</mosaic_0001>

<bundles_post_ra>
// kernel: tpu_custom_call.1
= control target key start
LH: loop header
LB: loop body
LE: loop exit
PB: predicated region body
PF: predicated region fallthrough
CT: control target
= control target key end

     0   :  { %6 = vsyncpa [#allocation4], 0  ;;  %s671_s0 = inlined_call_operand.hbm [shape: f32[2,4,16,128], index: 0, kind: input, shape index: {}]   ;;  %s672_s1 = inlined_call_operand.hbm [shape: f32[2,16,4,128], index: 1, kind: output, shape index: {}]  }
   0x1   :  { %8 = vsyncpa [#allocation4 + $0x1], 0  ;;  %s541_s6 = smov 0   ;;  %s543_s7 = smov 0  }
   0x2   :  { %s545_s8 = smov 0   ;;  %s547_s9 = smov 0  }
   0x3   :  { %s549_s10 = smov 0  }
   0x4 LB: > { %s239_s11 = sadd.s32 4294967295, %s525_s10   ;;  %s20_s12 = sadd.s32 1, %s517_s8  ;;  %s525_s10 = sphi %s549_s10, %s14_s10   ;;  %s521_s9 = sphi %s547_s9, %s678_s9   ;;  %s517_s8 = sphi %s545_s8, %s677_s8   ;;  %s513_s7 = sphi %s543_s7, %s676_s7   ;;  %s509_s6 = sphi %s541_s6, %s675_s6  }
   0x5   : > { %p21_p0 = scmp.ge.s32.totalorder %s20_s12, 2  ;;  %s23_s13 = sadd.s32 1, %s521_s9 }
   0x6   : > { %s32_s14 = sadd.s32 1, %s513_s7  ;;  %p36_p1 = scmp.eq.s32.totalorder %s525_s10, 3 }
   0x7   : > { %s680_s12 = smov (%p21_p0, %s20_s12), 0  ;;  %s682_s13 = smov (!%p21_p0, %s23_s13), %s521_s9 }
   0x8   : > { %s28_s15 = ssub.s32 %s517_s8, %s680_s12  ;;  %p41_p2 = scmp.ne.s32.totalorder %s513_s7, %s509_s6 }
   0x9   : > { %p25_p3 = scmp.ge.s32.totalorder %s682_s13, 2  ;;  %p42_p4 = scmp.eq.s32.totalorder %s239_s11, 3 }
   0xa   : > { %p279_p5 = scmp.lt.s32.totalorder %s525_s10, 4  ;;  %s56_s17 = sand.u32 1, %s513_s7  }
   0xb   : > { %s684_s13 = smov (%p25_p3, %s682_s13), 0  ;;  %p581_p6 = por %p42_p4, %p41_p2 }
   0xc   : > { %s27_s18 = ssub.s32 %s521_s9, %s684_s13  ;;  %s242_s19 = sshll.u32 %s56_s17, 5 }
   0xd   : > { %s29_s20 = sor.u32 %s28_s15, %s27_s18  ;;  %s243_s21 = sshll.u32 %s517_s8, 3 }
   0xe   : > { %p30_p7 = scmp.eq.s32.totalorder %s29_s20, 0  ;;  %p240_p8 = scmp.ne.s32.totalorder %s29_s20, 0 }
   0xf   : > { %s244_s22 = sshll.u32 %s521_s9, 6  ;;  %s58_s29 = scalar_lea.vmem [#allocation3], %s242_s19 }
  0x10   : > { %s593_s23 = scalar_select %p30_p7, %s513_s7, %s32_s14  }
  0x11   : > { %p597_p9 = por %p240_p8, %p36_p1  ;;  %s62_s25 = sadd.s32 %s244_s22, %s243_s21 }
  0x12   : > { %s63_s28 = scalar_lea.hbm %s671_s0, %s62_s25  ;;  %s66_s30 = sshll.u32 %s58_s29, 4  ;;  %s606_s30 = int_to_ptr.vmem [resolvable:$true] %s66_s30 }
  0x13   : > { %s64_s2 = sshll.u32 %s63_s28, 4  ;;  %s527_s3 = smov 16   ;;  %s65_s2 = int_to_ptr.hbm [resolvable:$true] %s64_s2 }
  0x14   : > { %s528_s4 = smov 64   ;;  %s529_s5 = smov 1  }
  0x15   : > { %264 = dma.hbm_to_vmem [thread:$0]  (%p279_p5), %s65_s2, 128, %s606_s30, [#allocation2], %s527_s3, %s528_s4, %s529_s5 }
  0x16   : > { %s200_s11 = scalar_lea.hbm %s63_s28, 16  ;;  %s75_s14 = scalar_lea.vmem %s58_s29, 1 [#allocation3] }
  0x17   : > { %s77_s15 = sshll.u32 %s200_s11, 4  ;;  %s79_s18 = sshll.u32 %s75_s14, 4  ;;  %s78_s15 = int_to_ptr.hbm [resolvable:$true] %s77_s15  ;;  %s80_s18 = int_to_ptr.vmem [resolvable:$true] %s79_s18 }
  0x18   : > { %265 = dma.hbm_to_vmem [thread:$0]  (%p279_p5), %s78_s15, 128, %s80_s18, [#allocation2 + $0x1], %s527_s3, %s528_s4, %s529_s5 }
  0x19   : > { %s205_s19 = scalar_lea.hbm %s63_s28, 32  ;;  %s88_s20 = scalar_lea.vmem %s58_s29, 2 [#allocation3] }
  0x1a   : > { %s90_s22 = sshll.u32 %s205_s19, 4  ;;  %s92_s25 = sshll.u32 %s88_s20, 4  ;;  %s91_s22 = int_to_ptr.hbm [resolvable:$true] %s90_s22  ;;  %s93_s25 = int_to_ptr.vmem [resolvable:$true] %s92_s25 }
  0x1b   : > { %266 = dma.hbm_to_vmem [thread:$0]  (%p279_p5), %s91_s22, 128, %s93_s25, [#allocation2 + $0x2], %s527_s3, %s528_s4, %s529_s5 }
  0x1c   : > { %s210_s26 = scalar_lea.hbm %s63_s28, 48  ;;  %s101_s27 = scalar_lea.vmem %s58_s29, 3 [#allocation3] }
  0x1d   : > { %s103_s2 = sshll.u32 %s210_s26, 4  ;;  %s105_s11 = sshll.u32 %s101_s27, 4  ;;  %s104_s2 = int_to_ptr.hbm [resolvable:$true] %s103_s2  ;;  %s106_s11 = int_to_ptr.vmem [resolvable:$true] %s105_s11 }
  0x1e   : > { %267 = dma.hbm_to_vmem [thread:$0]  (%p279_p5), %s104_s2, 128, %s106_s11, [#allocation2 + $0x3], %s527_s3, %s528_s4, %s529_s5 }
  0x1f   : > { %488 = dma.done.wait (%p279_p5), [#allocation2], 128 }
  0x20   : > { %490 = vsyncadd (%p279_p5), [#allocation2], 4294967168 }
  0x21   : > { %492 = dma.done.wait (%p279_p5), [#allocation2 + $0x1], 128 }
  0x22   : > { %494 = vsyncadd (%p279_p5), [#allocation2 + $0x1], 4294967168 }
  0x23   : > { %496 = dma.done.wait (%p279_p5), [#allocation2 + $0x2], 128 }
  0x24   : > { %498 = vsyncadd (%p279_p5), [#allocation2 + $0x2], 4294967168 }
  0x25   : > { %500 = dma.done.wait (%p279_p5), [#allocation2 + $0x3], 128 }
  0x26   : > { %502 = vsyncadd (%p279_p5), [#allocation2 + $0x3], 4294967168  ;;  %s253_s28 = sshll.u32 %s521_s9, 4  ;;  %p272_p10 = pnand %p279_p5, %p597_p9 }
  0x27   : > { %s132_s29 = sadd.s32 %s253_s28, %s243_s21  ;;  %p280_p11 = scmp.ge.s32.totalorder %s525_s10, 1 }
  0x28   : > { %s254_s3 = sshll.u32 %s132_s29, 2  ;;  %s121_s19 = scalar_lea.sflag [#allocation4], %s56_s17 }
  0x29   : > { %s134_s15 = scalar_lea.hbm %s672_s1, %s254_s3  ;;  %s530_s20 = smov 4  }
  0x2a   : > { %s137_s18 = sshll.u32 %s134_s15, 4  ;;  %s152_s9 = sand.u32 1, %s509_s6   ;;  %s138_s18 = int_to_ptr.hbm [resolvable:$true] %s137_s18 }
  0x2b   : > { %274 = dma.vmem_to_hbm [thread:$0]  (!%p272_p10), %s606_s30, 512, %s138_s18, %s121_s19, %s528_s4, %s528_s4, %s530_s20  }
  0x2c   : > { %p276_p12 = pnand %p280_p11, %p581_p6  ;;  %s153_s8 = scalar_lea.sflag [#allocation4], %s152_s9 }
  0x2e   : > { %p277_p13 = pneg %p276_p12 }
  0x30   : > { %504 = dma.done.wait (%p277_p13), %s153_s8, 512  }
  0x31   : > { %506 = vsyncadd (%p277_p13), %s153_s8, 4294966784  ;;  %s14_s10 = sadd.s32 1, %s525_s10   ;;  %s675_s6 = smov %s513_s7 }
  0x32   : > { %p11_p0 = scmp.ge.s32.totalorder %s14_s10, 5   ;;  %s676_s7 = smov %s593_s23 }
  0x33   : > { %s677_s8 = smov %s680_s12  ;;  %s678_s9 = smov %s684_s13 }
  0x34   :  { %13 = sbr.rel (!%p11_p0) target bundleno = 4 (0x4), region = 57 }
  0x39   :  { %159 = vsyncpa [#allocation4], 1 }
  0x3a   :  { %161 = vsyncpa [#allocation4 + $0x1], 1 }
  0x3b   :  { %162 = vsyncmov [#allocation2] }
  0x3e   :  { %s163_s16 = vpop.sfrf %162 }
  0x3f   :  { %p257_p1 = scmp.ne.s32.totalorder %s163_s16, 0 }
  0x41   :  { %167 = shalt.err (%p257_p1)  }
  0x42   :  { %169 = vsyncmov [#allocation2 + $0x1] }
  0x45   :  { %s170_s17 = vpop.sfrf %169 }
  0x46   :  { %p258_p2 = scmp.ne.s32.totalorder %s170_s17, 0 }
  0x48   :  { %174 = shalt.err (%p258_p2)  }
  0x49   :  { %176 = vsyncmov [#allocation2 + $0x2] }
  0x4c   :  { %s177_s21 = vpop.sfrf %176 }
  0x4d   :  { %p259_p3 = scmp.ne.s32.totalorder %s177_s21, 0 }
  0x4f   :  { %181 = shalt.err (%p259_p3)  }
  0x50   :  { %183 = vsyncmov [#allocation2 + $0x3] }
  0x53   :  { %s184_s12 = vpop.sfrf %183 }
  0x54   :  { %p260_p4 = scmp.ne.s32.totalorder %s184_s12, 0 }
  0x56   :  { %188 = shalt.err (%p260_p4)  }

</bundles_post_ra>
